<compile_context>
chip_gen: v6e
topology: v6e:2x2x1
jax: 0.10.0
libtpu: 0.0.40
codegen_flags: <defaults>
</compile_context>

<pallas_src>
import numpy as np
import jax
import jax.numpy as jnp
from jax.experimental import pallas as pl
from jax.experimental.pallas import tpu as pltpu

EPS = 1e-5


def residual_block_kernel(x_ref, w1_ref, w2_ref, g1_ref, b1_ref, g2_ref,
                          b2_ref, pool_ref, pool_t_ref, sdn_ref, sup_ref,
                          out_ref):
    N, WC = x_ref.shape                  # (B*H, W*C), lane-dense
    C = pool_ref.shape[1]
    n_stat = float(N * (WC // C))        # BN sample count per channel
    cdt = w1_ref.dtype                   # matmul compute dtype (bf16 or f32)

    x32 = x_ref[...]                     # resident f32 input (also the residual)
    sdn, sup = sdn_ref[...], sup_ref[...]
    pool, pool_t = pool_ref[...], pool_t_ref[...]

    def conv3x3(xc, w_ref):
        # xc: (N, W*C) activations in compute dtype.
        # w_ref: (3, W*C, W*C) folded weights, one matrix per kh tap (kw taps,
        # channel mix and SAME padding along W are folded into K = W*C).
        # SAME padding along H: shift the input rows with tiny banded 0/1
        # matmuls on the MXU (exact row select, zero at image boundaries; no
        # sublane-misaligned slices, no padded scratch, no memsets).
        xdn = jnp.dot(sdn, xc, preferred_element_type=jnp.float32).astype(cdt)
        xup = jnp.dot(sup, xc, preferred_element_type=jnp.float32).astype(cdt)
        return (jnp.dot(xdn, w_ref[0], preferred_element_type=jnp.float32)
                + jnp.dot(xc, w_ref[1], preferred_element_type=jnp.float32)
                + jnp.dot(xup, w_ref[2], preferred_element_type=jnp.float32))

    def bn_train(acc, gamma, beta):
        # Single-pass training-mode BatchNorm on (N, W*C) flattened activations:
        # one read of acc gives col-sum and col-sum-of-squares, pooled per
        # channel with a single stacked matmul; var = E[x^2] - mu^2.  All f32.
        stats = jnp.concatenate(
            [jnp.sum(acc, axis=0, keepdims=True),
             jnp.sum(acc * acc, axis=0, keepdims=True)], axis=0)        # (2, W*C)
        pooled = jnp.dot(stats, pool,
                         preferred_element_type=jnp.float32) / n_stat   # (2, C)
        mu = pooled[0:1, :]
        var = pooled[1:2, :] - mu * mu
        scale_c = gamma * jax.lax.rsqrt(var + EPS)                       # (1, C)
        shift_c = beta - scale_c * mu                                    # (1, C)
        ss = jnp.dot(jnp.concatenate([scale_c, shift_c], axis=0), pool_t,
                     preferred_element_type=jnp.float32)                 # (2, W*C)
        return acc * ss[0:1, :] + ss[1:2, :]

    # -- stage 1: conv1 -> bn1 -> relu (h1 never leaves VMEM/vregs) --
    h1 = jnp.maximum(
        bn_train(conv3x3(x32.astype(cdt), w1_ref), g1_ref[...], b1_ref[...]),
        0.0)
    # -- stage 2: conv2 -> bn2 -> + residual -> relu --
    y = bn_train(conv3x3(h1.astype(cdt), w2_ref), g2_ref[...], b2_ref[...])
    out_ref[...] = jnp.maximum(y + x32, 0.0)


def _fold_conv3x3_weights(w_hwio, W):
    """(3,3,Cin,Cout) HWIO -> (3, W*Cin, W*Cout) folded per-kh matrices.

    F[dh][wi*Cin + ci, wo*Cout + co] = w[dh, wi - wo + 1, ci, co] when
    wi - wo + 1 in {0,1,2} and 0 <= wi < W; out-of-range kw taps (SAME pad
    along W) are simply absent, so no padded columns are needed at all.
    """
    kh, kw, Cin, Cout = w_hwio.shape
    sel = np.zeros((kw, W, W), np.float32)            # sel[dw, wi, wo]
    for dw in range(kw):
        for wo in range(W):
            wi = wo + dw - 1
            if 0 <= wi < W:
                sel[dw, wi, wo] = 1.0
    folded = jnp.einsum('dpw,hdio->hpiwo', jnp.asarray(sel),
                        w_hwio.astype(jnp.float32))
    return folded.reshape(kh, W * Cin, W * Cout)


def _channel_pool_matrices(W, C):
    pool = np.tile(np.eye(C, dtype=np.float32), (W, 1))       # (W*C, C)
    return jnp.asarray(pool), jnp.asarray(np.ascontiguousarray(pool.T))


def _row_shift_matrices(B, H):
    """Banded 0/1 matrices: (dn @ p)[i] = p[i-1], (up @ p)[i] = p[i+1],
    zero across image (batch-block) boundaries — SAME pad along H."""
    N = B * H
    dn = np.zeros((N, N), np.float32)
    up = np.zeros((N, N), np.float32)
    for b in range(B):
        for h in range(H):
            i = b * H + h
            if h > 0:
                dn[i, i - 1] = 1.0
            if h < H - 1:
                up[i, i + 1] = 1.0
    return jnp.asarray(dn), jnp.asarray(up)


def residual_block(x_nchw, w1, g1, b1, w2, g2, b2, *,
                   compute_dtype=jnp.bfloat16):
    """Forward pass of ResidualBlock (stride=1, downsample=None).

    x_nchw: (B, C, H, W) f32; w1/w2: (3, 3, C, C) HWIO; g/b: (C,) BN affine.
    compute_dtype: dtype of the conv matmul operands (accumulation is f32).
    """
    x = jnp.transpose(x_nchw, (0, 2, 3, 1)).astype(jnp.float32)   # NCHW -> NHWC
    B, H, W, C = x.shape
    WC, N = W * C, B * H

    x_flat = x.reshape(N, WC)                                 # lane-dense
    w1f = _fold_conv3x3_weights(w1, W).astype(compute_dtype)
    w2f = _fold_conv3x3_weights(w2, W).astype(compute_dtype)
    pool, pool_t = _channel_pool_matrices(W, C)               # f32 (BN path)
    sdn, sup = _row_shift_matrices(B, H)
    sdn, sup = sdn.astype(compute_dtype), sup.astype(compute_dtype)
    g1r = g1.reshape(1, C).astype(jnp.float32)
    b1r = b1.reshape(1, C).astype(jnp.float32)
    g2r = g2.reshape(1, C).astype(jnp.float32)
    b2r = b2.reshape(1, C).astype(jnp.float32)

    vmem = pl.BlockSpec(memory_space=pltpu.MemorySpace.VMEM)
    out_flat = pl.pallas_call(
        residual_block_kernel,
        out_shape=jax.ShapeDtypeStruct((N, WC), jnp.float32),
        in_specs=[vmem] * 11,
        out_specs=vmem,
    )(x_flat, w1f, w2f, g1r, b1r, g2r, b2r, pool, pool_t, sdn, sup)

    out = out_flat.reshape(B, H, W, C)
    return jnp.transpose(out, (0, 3, 1, 2))                        # NHWC -> NCHW


def ref_forward(x_nchw, w1, g1, b1, w2, g2, b2):
    """Pure-JAX reference (mirrors PyTorch forward in training mode)."""
    x = jnp.transpose(x_nchw, (0, 2, 3, 1))
    dn = jax.lax.conv_dimension_numbers(x.shape, w1.shape, ('NHWC', 'HWIO', 'NHWC'))

    def bn(y, g, b):
        mu = jnp.mean(y, axis=(0, 1, 2), keepdims=True)
        var = jnp.mean((y - mu) ** 2, axis=(0, 1, 2), keepdims=True)
        return (y - mu) * jax.lax.rsqrt(var + EPS) * g + b

    h = jax.lax.conv_general_dilated(x, w1, (1, 1), 'SAME', dimension_numbers=dn)
    h = jnp.maximum(bn(h, g1, b1), 0.0)
    h2 = jax.lax.conv_general_dilated(h, w2, (1, 1), 'SAME', dimension_numbers=dn)
    h2 = bn(h2, g2, b2)
    out = jnp.maximum(h2 + x, 0.0)
    return jnp.transpose(out, (0, 3, 1, 2))


if __name__ == "__main__":
    B, C, H, W = 2, 8, 16, 16          # W * C = 128 -> lane-dense activations
    key = jax.random.PRNGKey(0)
    ks = jax.random.split(key, 7)
    x = jax.random.normal(ks[0], (B, C, H, W), jnp.float32)
    # conv weights in HWIO (kh, kw, Cin, Cout); bias=False as in conv3x3.
    w1 = jax.random.normal(ks[1], (3, 3, C, C), jnp.float32) * 0.1
    w2 = jax.random.normal(ks[2], (3, 3, C, C), jnp.float32) * 0.1
    # BatchNorm affine params (deterministic, non-trivial).
    g1 = jax.random.uniform(ks[3], (C,), jnp.float32, 0.5, 1.5)
    b1 = jax.random.normal(ks[4], (C,), jnp.float32) * 0.1
    g2 = jax.random.uniform(ks[5], (C,), jnp.float32, 0.5, 1.5)
    b2 = jax.random.normal(ks[6], (C,), jnp.float32) * 0.1

    ref = ref_forward(x, w1, g1, b1, w2, g2, b2)

    # f32 matmul operands: tight structural / numerical check.
    out32 = jax.block_until_ready(
        residual_block(x, w1, g1, b1, w2, g2, b2, compute_dtype=jnp.float32))
    assert out32.shape == (B, C, H, W)
    err32 = float(jnp.max(jnp.abs(out32 - ref)))
    assert jnp.allclose(out32, ref, atol=1e-2, rtol=1e-2), f"f32 max abs err = {err32}"

    # bf16 matmul operands (default MXU fast path), f32 accumulation + f32 BN.
    out16 = jax.block_until_ready(residual_block(x, w1, g1, b1, w2, g2, b2))
    assert out16.shape == (B, C, H, W)
    err16 = float(jnp.max(jnp.abs(out16 - ref)))
    assert jnp.allclose(out16, ref, atol=1e-1, rtol=1e-1), f"bf16 max abs err = {err16}"

    print("KERNEL_OK")
</pallas_src>

<mosaic_0001>
module attributes {stable_mosaic.version = 11 : i64} {
  func.func @residual_block_kernel(%arg0: memref<32x128xf32, #tpu.memory_space<vmem>>, %arg1: memref<3x128x128xf32, #tpu.memory_space<vmem>>, %arg2: memref<3x128x128xf32, #tpu.memory_space<vmem>>, %arg3: memref<1x8xf32, #tpu.memory_space<vmem>>, %arg4: memref<1x8xf32, #tpu.memory_space<vmem>>, %arg5: memref<1x8xf32, #tpu.memory_space<vmem>>, %arg6: memref<1x8xf32, #tpu.memory_space<vmem>>, %arg7: memref<128x8xf32, #tpu.memory_space<vmem>>, %arg8: memref<8x128xf32, #tpu.memory_space<vmem>>, %arg9: memref<32x32xf32, #tpu.memory_space<vmem>>, %arg10: memref<32x32xf32, #tpu.memory_space<vmem>>, %arg11: memref<32x128xf32, #tpu.memory_space<vmem>>) attributes {dimension_semantics = [], scalar_prefetch = 0 : i64, scratch_operands = 0 : i64, tpu.core_type = #tpu.core_type<tc>} {
    %c0 = arith.constant 0 : index
    %c0_0 = arith.constant 0 : index
    %0 = vector.load %arg0[%c0, %c0_0] : memref<32x128xf32, #tpu.memory_space<vmem>>, vector<32x128xf32>
    %c0_1 = arith.constant 0 : index
    %c0_2 = arith.constant 0 : index
    %1 = vector.load %arg9[%c0_1, %c0_2] : memref<32x32xf32, #tpu.memory_space<vmem>>, vector<32x32xf32>
    %c0_3 = arith.constant 0 : index
    %c0_4 = arith.constant 0 : index
    %2 = vector.load %arg10[%c0_3, %c0_4] : memref<32x32xf32, #tpu.memory_space<vmem>>, vector<32x32xf32>
    %c0_5 = arith.constant 0 : index
    %c0_6 = arith.constant 0 : index
    %3 = vector.load %arg7[%c0_5, %c0_6] : memref<128x8xf32, #tpu.memory_space<vmem>>, vector<128x8xf32>
    %c0_7 = arith.constant 0 : index
    %c0_8 = arith.constant 0 : index
    %4 = vector.load %arg8[%c0_7, %c0_8] : memref<8x128xf32, #tpu.memory_space<vmem>>, vector<8x128xf32>
    %cst = arith.constant dense<0.000000e+00> : vector<32x128xf32>
    %5 = tpu.matmul %1, %0, %cst {dimension_numbers = #tpu.dot_dimension_numbers<[1], [0], [0], [1], [0, 0, 1, 1], [], []>} : vector<32x32xf32>, vector<32x128xf32>, vector<32x128xf32> -> vector<32x128xf32>
    %cst_9 = arith.constant dense<0.000000e+00> : vector<32x128xf32>
    %6 = tpu.matmul %2, %0, %cst_9 {dimension_numbers = #tpu.dot_dimension_numbers<[1], [0], [0], [1], [0, 0, 1, 1], [], []>} : vector<32x32xf32>, vector<32x128xf32>, vector<32x128xf32> -> vector<32x128xf32>
    %c0_10 = arith.constant 0 : index
    %c0_11 = arith.constant 0 : index
    %c0_12 = arith.constant 0 : index
    %7 = vector.load %arg1[%c0_10, %c0_11, %c0_12] : memref<3x128x128xf32, #tpu.memory_space<vmem>>, vector<1x128x128xf32>
    %8 = vector.shape_cast %7 : vector<1x128x128xf32> to vector<128x128xf32>
    %cst_13 = arith.constant dense<0.000000e+00> : vector<32x128xf32>
    %9 = tpu.matmul %5, %8, %cst_13 {dimension_numbers = #tpu.dot_dimension_numbers<[1], [0], [0], [1], [0, 0, 1, 1], [], []>} : vector<32x128xf32>, vector<128x128xf32>, vector<32x128xf32> -> vector<32x128xf32>
    %c1 = arith.constant 1 : index
    %c0_14 = arith.constant 0 : index
    %c0_15 = arith.constant 0 : index
    %10 = vector.load %arg1[%c1, %c0_14, %c0_15] : memref<3x128x128xf32, #tpu.memory_space<vmem>>, vector<1x128x128xf32>
    %11 = vector.shape_cast %10 : vector<1x128x128xf32> to vector<128x128xf32>
    %cst_16 = arith.constant dense<0.000000e+00> : vector<32x128xf32>
    %12 = tpu.matmul %0, %11, %cst_16 {dimension_numbers = #tpu.dot_dimension_numbers<[1], [0], [0], [1], [0, 0, 1, 1], [], []>} : vector<32x128xf32>, vector<128x128xf32>, vector<32x128xf32> -> vector<32x128xf32>
    %13 = arith.addf %9, %12 : vector<32x128xf32>
    %c2 = arith.constant 2 : index
    %c0_17 = arith.constant 0 : index
    %c0_18 = arith.constant 0 : index
    %14 = vector.load %arg1[%c2, %c0_17, %c0_18] : memref<3x128x128xf32, #tpu.memory_space<vmem>>, vector<1x128x128xf32>
    %15 = vector.shape_cast %14 : vector<1x128x128xf32> to vector<128x128xf32>
    %cst_19 = arith.constant dense<0.000000e+00> : vector<32x128xf32>
    %16 = tpu.matmul %6, %15, %cst_19 {dimension_numbers = #tpu.dot_dimension_numbers<[1], [0], [0], [1], [0, 0, 1, 1], [], []>} : vector<32x128xf32>, vector<128x128xf32>, vector<32x128xf32> -> vector<32x128xf32>
    %17 = arith.addf %13, %16 : vector<32x128xf32>
    %c0_20 = arith.constant 0 : index
    %c0_21 = arith.constant 0 : index
    %18 = vector.load %arg3[%c0_20, %c0_21] : memref<1x8xf32, #tpu.memory_space<vmem>>, vector<1x8xf32>
    %c0_22 = arith.constant 0 : index
    %c0_23 = arith.constant 0 : index
    %19 = vector.load %arg4[%c0_22, %c0_23] : memref<1x8xf32, #tpu.memory_space<vmem>>, vector<1x8xf32>
    %cst_24 = arith.constant dense<0.000000e+00> : vector<128xf32>
    %20 = vector.multi_reduction <add>, %17, %cst_24 [0] : vector<32x128xf32> to vector<128xf32>
    %21 = vector.shape_cast %20 : vector<128xf32> to vector<1x128xf32>
    %22 = arith.mulf %17, %17 : vector<32x128xf32>
    %cst_25 = arith.constant dense<0.000000e+00> : vector<128xf32>
    %23 = vector.multi_reduction <add>, %22, %cst_25 [0] : vector<32x128xf32> to vector<128xf32>
    %24 = vector.shape_cast %23 : vector<128xf32> to vector<1x128xf32>
    %25 = tpu.concatenate %21, %24 in 0 : vector<1x128xf32>, vector<1x128xf32> -> vector<2x128xf32>
    %cst_26 = arith.constant dense<0.000000e+00> : vector<2x8xf32>
    %26 = tpu.matmul %25, %3, %cst_26 {dimension_numbers = #tpu.dot_dimension_numbers<[1], [0], [0], [1], [0, 0, 1, 1], [], []>} : vector<2x128xf32>, vector<128x8xf32>, vector<2x8xf32> -> vector<2x8xf32>
    %cst_27 = arith.constant 5.120000e+02 : f32
    %27 = vector.broadcast %cst_27 : f32 to vector<2x8xf32>
    %28 = arith.divf %26, %27 : vector<2x8xf32>
    %29 = vector.extract_strided_slice %28 {offsets = [0, 0], sizes = [1, 8], strides = [1, 1]} : vector<2x8xf32> to vector<1x8xf32>
    %30 = vector.extract_strided_slice %28 {offsets = [1, 0], sizes = [1, 8], strides = [1, 1]} : vector<2x8xf32> to vector<1x8xf32>
    %31 = arith.mulf %29, %29 : vector<1x8xf32>
    %32 = arith.subf %30, %31 : vector<1x8xf32>
    %cst_28 = arith.constant 9.99999974E-6 : f32
    %33 = vector.broadcast %cst_28 : f32 to vector<1x8xf32>
    %34 = arith.addf %32, %33 : vector<1x8xf32>
    %35 = math.rsqrt %34 : vector<1x8xf32>
    %36 = arith.mulf %18, %35 : vector<1x8xf32>
    %37 = arith.mulf %36, %29 : vector<1x8xf32>
    %38 = arith.subf %19, %37 : vector<1x8xf32>
    %39 = tpu.concatenate %36, %38 in 0 : vector<1x8xf32>, vector<1x8xf32> -> vector<2x8xf32>
    %cst_29 = arith.constant dense<0.000000e+00> : vector<2x128xf32>
    %40 = tpu.matmul %39, %4, %cst_29 {dimension_numbers = #tpu.dot_dimension_numbers<[1], [0], [0], [1], [0, 0, 1, 1], [], []>} : vector<2x8xf32>, vector<8x128xf32>, vector<2x128xf32> -> vector<2x128xf32>
    %41 = vector.extract_strided_slice %40 {offsets = [0, 0], sizes = [1, 128], strides = [1, 1]} : vector<2x128xf32> to vector<1x128xf32>
    %42 = vector.broadcast %41 : vector<1x128xf32> to vector<32x128xf32>
    %43 = arith.mulf %17, %42 : vector<32x128xf32>
    %44 = vector.extract_strided_slice %40 {offsets = [1, 0], sizes = [1, 128], strides = [1, 1]} : vector<2x128xf32> to vector<1x128xf32>
    %45 = vector.broadcast %44 : vector<1x128xf32> to vector<32x128xf32>
    %46 = arith.addf %43, %45 : vector<32x128xf32>
    %cst_30 = arith.constant 0.000000e+00 : f32
    %47 = vector.broadcast %cst_30 : f32 to vector<32x128xf32>
    %48 = arith.maximumf %46, %47 : vector<32x128xf32>
    %cst_31 = arith.constant dense<0.000000e+00> : vector<32x128xf32>
    %49 = tpu.matmul %1, %48, %cst_31 {dimension_numbers = #tpu.dot_dimension_numbers<[1], [0], [0], [1], [0, 0, 1, 1], [], []>} : vector<32x32xf32>, vector<32x128xf32>, vector<32x128xf32> -> vector<32x128xf32>
    %cst_32 = arith.constant dense<0.000000e+00> : vector<32x128xf32>
    %50 = tpu.matmul %2, %48, %cst_32 {dimension_numbers = #tpu.dot_dimension_numbers<[1], [0], [0], [1], [0, 0, 1, 1], [], []>} : vector<32x32xf32>, vector<32x128xf32>, vector<32x128xf32> -> vector<32x128xf32>
    %c0_33 = arith.constant 0 : index
    %c0_34 = arith.constant 0 : index
    %c0_35 = arith.constant 0 : index
    %51 = vector.load %arg2[%c0_33, %c0_34, %c0_35] : memref<3x128x128xf32, #tpu.memory_space<vmem>>, vector<1x128x128xf32>
    %52 = vector.shape_cast %51 : vector<1x128x128xf32> to vector<128x128xf32>
    %cst_36 = arith.constant dense<0.000000e+00> : vector<32x128xf32>
    %53 = tpu.matmul %49, %52, %cst_36 {dimension_numbers = #tpu.dot_dimension_numbers<[1], [0], [0], [1], [0, 0, 1, 1], [], []>} : vector<32x128xf32>, vector<128x128xf32>, vector<32x128xf32> -> vector<32x128xf32>
    %c1_37 = arith.constant 1 : index
    %c0_38 = arith.constant 0 : index
    %c0_39 = arith.constant 0 : index
    %54 = vector.load %arg2[%c1_37, %c0_38, %c0_39] : memref<3x128x128xf32, #tpu.memory_space<vmem>>, vector<1x128x128xf32>
    %55 = vector.shape_cast %54 : vector<1x128x128xf32> to vector<128x128xf32>
    %cst_40 = arith.constant dense<0.000000e+00> : vector<32x128xf32>
    %56 = tpu.matmul %48, %55, %cst_40 {dimension_numbers = #tpu.dot_dimension_numbers<[1], [0], [0], [1], [0, 0, 1, 1], [], []>} : vector<32x128xf32>, vector<128x128xf32>, vector<32x128xf32> -> vector<32x128xf32>
    %57 = arith.addf %53, %56 : vector<32x128xf32>
    %c2_41 = arith.constant 2 : index
    %c0_42 = arith.constant 0 : index
    %c0_43 = arith.constant 0 : index
    %58 = vector.load %arg2[%c2_41, %c0_42, %c0_43] : memref<3x128x128xf32, #tpu.memory_space<vmem>>, vector<1x128x128xf32>
    %59 = vector.shape_cast %58 : vector<1x128x128xf32> to vector<128x128xf32>
    %cst_44 = arith.constant dense<0.000000e+00> : vector<32x128xf32>
    %60 = tpu.matmul %50, %59, %cst_44 {dimension_numbers = #tpu.dot_dimension_numbers<[1], [0], [0], [1], [0, 0, 1, 1], [], []>} : vector<32x128xf32>, vector<128x128xf32>, vector<32x128xf32> -> vector<32x128xf32>
    %61 = arith.addf %57, %60 : vector<32x128xf32>
    %c0_45 = arith.constant 0 : index
    %c0_46 = arith.constant 0 : index
    %62 = vector.load %arg5[%c0_45, %c0_46] : memref<1x8xf32, #tpu.memory_space<vmem>>, vector<1x8xf32>
    %c0_47 = arith.constant 0 : index
    %c0_48 = arith.constant 0 : index
    %63 = vector.load %arg6[%c0_47, %c0_48] : memref<1x8xf32, #tpu.memory_space<vmem>>, vector<1x8xf32>
    %cst_49 = arith.constant dense<0.000000e+00> : vector<128xf32>
    %64 = vector.multi_reduction <add>, %61, %cst_49 [0] : vector<32x128xf32> to vector<128xf32>
    %65 = vector.shape_cast %64 : vector<128xf32> to vector<1x128xf32>
    %66 = arith.mulf %61, %61 : vector<32x128xf32>
    %cst_50 = arith.constant dense<0.000000e+00> : vector<128xf32>
    %67 = vector.multi_reduction <add>, %66, %cst_50 [0] : vector<32x128xf32> to vector<128xf32>
    %68 = vector.shape_cast %67 : vector<128xf32> to vector<1x128xf32>
    %69 = tpu.concatenate %65, %68 in 0 : vector<1x128xf32>, vector<1x128xf32> -> vector<2x128xf32>
    %cst_51 = arith.constant dense<0.000000e+00> : vector<2x8xf32>
    %70 = tpu.matmul %69, %3, %cst_51 {dimension_numbers = #tpu.dot_dimension_numbers<[1], [0], [0], [1], [0, 0, 1, 1], [], []>} : vector<2x128xf32>, vector<128x8xf32>, vector<2x8xf32> -> vector<2x8xf32>
    %cst_52 = arith.constant 5.120000e+02 : f32
    %71 = vector.broadcast %cst_52 : f32 to vector<2x8xf32>
    %72 = arith.divf %70, %71 : vector<2x8xf32>
    %73 = vector.extract_strided_slice %72 {offsets = [0, 0], sizes = [1, 8], strides = [1, 1]} : vector<2x8xf32> to vector<1x8xf32>
    %74 = vector.extract_strided_slice %72 {offsets = [1, 0], sizes = [1, 8], strides = [1, 1]} : vector<2x8xf32> to vector<1x8xf32>
    %75 = arith.mulf %73, %73 : vector<1x8xf32>
    %76 = arith.subf %74, %75 : vector<1x8xf32>
    %cst_53 = arith.constant 9.99999974E-6 : f32
    %77 = vector.broadcast %cst_53 : f32 to vector<1x8xf32>
    %78 = arith.addf %76, %77 : vector<1x8xf32>
    %79 = math.rsqrt %78 : vector<1x8xf32>
    %80 = arith.mulf %62, %79 : vector<1x8xf32>
    %81 = arith.mulf %80, %73 : vector<1x8xf32>
    %82 = arith.subf %63, %81 : vector<1x8xf32>
    %83 = tpu.concatenate %80, %82 in 0 : vector<1x8xf32>, vector<1x8xf32> -> vector<2x8xf32>
    %cst_54 = arith.constant dense<0.000000e+00> : vector<2x128xf32>
    %84 = tpu.matmul %83, %4, %cst_54 {dimension_numbers = #tpu.dot_dimension_numbers<[1], [0], [0], [1], [0, 0, 1, 1], [], []>} : vector<2x8xf32>, vector<8x128xf32>, vector<2x128xf32> -> vector<2x128xf32>
    %85 = vector.extract_strided_slice %84 {offsets = [0, 0], sizes = [1, 128], strides = [1, 1]} : vector<2x128xf32> to vector<1x128xf32>
    %86 = vector.broadcast %85 : vector<1x128xf32> to vector<32x128xf32>
    %87 = arith.mulf %61, %86 : vector<32x128xf32>
    %88 = vector.extract_strided_slice %84 {offsets = [1, 0], sizes = [1, 128], strides = [1, 1]} : vector<2x128xf32> to vector<1x128xf32>
    %89 = vector.broadcast %88 : vector<1x128xf32> to vector<32x128xf32>
    %90 = arith.addf %87, %89 : vector<32x128xf32>
    %91 = arith.addf %90, %0 : vector<32x128xf32>
    %cst_55 = arith.constant 0.000000e+00 : f32
    %92 = vector.broadcast %cst_55 : f32 to vector<32x128xf32>
    %93 = arith.maximumf %91, %92 : vector<32x128xf32>
    %c0_56 = arith.constant 0 : index
    %c0_57 = arith.constant 0 : index
    %94 = vector.load %arg11[%c0_56, %c0_57] : memref<32x128xf32, #tpu.memory_space<vmem>>, vector<32x128xf32>
    tpu.vector_store %arg11[%c0_56, %c0_57], %93 {strides = array<i32>} : memref<32x128xf32, #tpu.memory_space<vmem>>, vector<32x128xf32>,
    return
  }
}

</mosaic_0001>

<bundles_post_ra>
// kernel: tpu_custom_call.1
= control target key start
LH: loop header
LB: loop body
LE: loop exit
PB: predicated region body
PF: predicated region fallthrough
CT: control target
= control target key end

     0   :  { %16 = vsyncpa [#allocation3], 0  ;;  %s2644_s0 = inlined_call_operand.vmem [shape: f32[32,128], index: 0, kind: input, shape index: {}]   ;;  %s2645_s1 = inlined_call_operand.hbm [shape: f32[3,128,128], index: 1, kind: input, shape index: {}]   ;;  %s2646_s2 = inlined_call_operand.hbm [shape: f32[3,128,128], index: 2, kind: input, shape index: {}]   ;;  %s2647_s3 = inlined_call_operand.vmem [shape: f32[1,8], index: 3, kind: input, shape index: {}]   ;;  %s2648_s4 = inlined_call_operand.vmem [shape: f32[1,8], index: 4, kind: input, shape index: {}]   ;;  %s2649_s5 = inlined_call_operand.vmem [shape: f32[1,8], index: 5, kind: input, shape index: {}]   ;;  %s2650_s6 = inlined_call_operand.vmem [shape: f32[1,8], index: 6, kind: input, shape index: {}]   ;;  %s2651_s7 = inlined_call_operand.vmem [shape: f32[128,8], index: 7, kind: input, shape index: {}]   ;;  %s2652_s8 = inlined_call_operand.vmem [shape: f32[8,128], index: 8, kind: input, shape index: {}]   ;;  %s2653_s9 = inlined_call_operand.vmem [shape: f32[32,32], index: 9, kind: input, shape index: {}]   ;;  %s2654_s10 = inlined_call_operand.vmem [shape: f32[32,32], index: 10, kind: input, shape index: {}]   ;;  %s2655_s11 = inlined_call_operand.hbm [shape: f32[32,128], index: 11, kind: output, shape index: {}]  }
   0x1   :  { %17 = vsyncpa [#allocation6], 0 }
   0x2   :  { %18 = vsyncpa [#allocation4], 0  ;;  %s2208_s17 = smov [#allocation2]  }
   0x3   :  { %s26_s18 = sshll.u32 %s2208_s17, 4  ;;  %s27_s18 = int_to_ptr.vmem [resolvable:$true] %s26_s18 }
   0x4   :  { %s2150_s19 = scalar_lea.vmem %s27_s18, 6144  ;;  %p2155_p1 = scmp.lt.s32.totalorder %s27_s18, %s27_s18 }
   0x5   :  { %p2151_p0 = scmp.ne.s32.totalorder %s27_s18, %s2150_s19  ;;  %p2156_p2 = scmp.lt.s32.totalorder %s2150_s19, %s2150_s19 }
   0x7   :  { %p2157_p3 = por %p2156_p2, %p2155_p1 }
   0x9   :  { %p2158_p4 = pnand %p2157_p3, %p2151_p0 }
   0xb   :  { %2161 = shalt.err (!%p2158_p4)
}
   0xc   :  { %s2209_s20 = smov 128   ;;  %s2210_s21 = smov 8  }
   0xd   :  { %32 = dma.hbm_to_vmem [thread:$0]  %s2645_s1, 6144, %s27_s18, [#allocation3], %s2209_s20, %s2209_s20, %s2210_s21  }
   0xe   :  { %s2211_s24 = smov [#allocation5]  }
   0xf   :  { %s38_s25 = sshll.u32 %s2211_s24, 4  ;;  %s39_s25 = int_to_ptr.vmem [resolvable:$true] %s38_s25 }
  0x10   :  { %s2170_s26 = scalar_lea.vmem %s39_s25, 6144  ;;  %p2175_p6 = scmp.lt.s32.totalorder %s39_s25, %s39_s25 }
  0x11   :  { %p2171_p5 = scmp.ne.s32.totalorder %s39_s25, %s2170_s26  ;;  %p2176_p7 = scmp.lt.s32.totalorder %s2170_s26, %s2170_s26 }
  0x13   :  { %p2177_p8 = por %p2176_p7, %p2175_p6 }
  0x15   :  { %p2178_p9 = pnand %p2177_p8, %p2171_p5 }
  0x17   :  { %2181 = shalt.err (!%p2178_p9)
}
  0x18   :  { %44 = dma.hbm_to_vmem [thread:$0]  %s2646_s2, 6144, %s39_s25, [#allocation6], %s2209_s20, %s2209_s20, %s2210_s21  }
  0x19   :  { %2202 = dma.done.wait [#allocation3], 6144  }
  0x1a   :  { %2203 = vsyncadd [#allocation3], 4294961152 }
  0x1b   :  { %2204 = dma.done.wait [#allocation6], 6144  }
  0x1c   :  { %2205 = vsyncadd [#allocation6], 4294961152  ;;  %v2291_v0 = vld [vmem:[%s2644_s0 + $0x18] sm:$0xff]  ;;  %v2296_v1 = vld [vmem:[%s2644_s0 + $0x10] sm:$0xff]  ;;  %vm96_vm0 = vcmask 261120   ;;  %v2212_v60 = vmov 0.0  }
  0x1d   :  { %1762 = vmatprep.subr.mxu0 %v2291_v0  ;;  %1776 = vmatprep.subr.mxu1 %v2291_v0  ;;  %v2305_v2 = vld [vmem:[%s2644_s0 + $0x8] sm:$0xff]  ;;  %v67_v3 = vld [vmem:[%s2644_s0] sm:$0xff]  ;;  %v2343_v8 = vld [vmem:[%s2653_s9 + $0x10] sm:$0xff]  ;;  %vm2213_vm1 = vmmov 0   ;;  %vm624_vm2 = vcmask 1040384   ;;  %vm732_vm3 = vcmask 64512  }
  0x1e   :  { %1763 = vmatpush3.msra.mxu0 %v2291_v0  ;;  %1777 = vmatpush3.msra.mxu1 %v2291_v0  ;;  %v2319_v4 = vld [vmem:[%s2653_s9] sm:$0xff]  ;;  %v2331_v6 = vld [vmem:[%s2653_s9 + $0x8] sm:$0xff]  ;;  %v2348_v9 = vld [vmem:[%s2654_s10 + $0x10] sm:$0xff] }
  0x1f   :  { %1764 = vmatprep.subr.mxu0 %v2296_v1  ;;  %1778 = vmatprep.subr.mxu1 %v2296_v1  ;;  %v2326_v5 = vld [vmem:[%s2654_s10] sm:$0xff]  ;;  %v2336_v7 = vld [vmem:[%s2654_s10 + $0x8] sm:$0xff]  ;;  %v323_v10 = vld [vmem:[#allocation2 + $0xf8] sm:$0xff] }
  0x20   :  { %1765 = vmatpush3.msra.mxu0 %v2296_v1  ;;  %1779 = vmatpush3.msra.mxu1 %v2296_v1  ;;  %v306_v11 = vld [vmem:[#allocation2 + $0x78] sm:$0xff]  ;;  %v322_v14 = vld [vmem:[#allocation2 + $0xf0] sm:$0xff]  ;;  %v321_v16 = vld [vmem:[#allocation2 + $0xe8] sm:$0xff] }
  0x21   :  { %1766 = vmatprep.subr.mxu0 %v2305_v2  ;;  %1780 = vmatprep.subr.mxu1 %v2305_v2  ;;  %v2363_v12 = vld [vmem:[%s2653_s9 + $0x18] sm:$0xff]  ;;  %v305_v15 = vld [vmem:[#allocation2 + $0x70] sm:$0xff]  ;;  %v304_v17 = vld [vmem:[#allocation2 + $0x68] sm:$0xff] }
  0x22   :  { %1767 = vmatpush3.msra.mxu0 %v2305_v2  ;;  %1781 = vmatpush3.msra.mxu1 %v2305_v2  ;;  %v2368_v13 = vld [vmem:[%s2654_s10 + $0x18] sm:$0xff]  ;;  %v320_v18 = vld [vmem:[#allocation2 + $0xe0] sm:$0xff]  ;;  %v318_v22 = vld [vmem:[#allocation2 + $0xd0] sm:$0xff] }
  0x23   :  { %1768 = vmatprep.subr.mxu0 %v67_v3  ;;  %1782 = vmatprep.subr.mxu1 %v67_v3  ;;  %v303_v19 = vld [vmem:[#allocation2 + $0x60] sm:$0xff]  ;;  %v319_v20 = vld [vmem:[#allocation2 + $0xd8] sm:$0xff]  ;;  %v301_v23 = vld [vmem:[#allocation2 + $0x50] sm:$0xff] }
  0x24   :  { %1769 = vmatpush3.msra.mxu0 %v67_v3  ;;  %1770 = vmatprep.mubr.msk.f32.mxu0 %vm96_vm0, %v2319_v4  ;;  %v302_v21 = vld [vmem:[#allocation2 + $0x58] sm:$0xff]  ;;  %v317_v24 = vld [vmem:[#allocation2 + $0xc8] sm:$0xff]  ;;  %v316_v26 = vld [vmem:[#allocation2 + $0xc0] sm:$0xff] }
  0x25   :  { %1783 = vmatpush3.msra.mxu1 %v67_v3  ;;  %1784 = vmatprep.mubr.msk.f32.mxu1 %vm96_vm0, %v2326_v5  ;;  %v300_v25 = vld [vmem:[#allocation2 + $0x48] sm:$0xff]  ;;  %v299_v27 = vld [vmem:[#allocation2 + $0x40] sm:$0xff]  ;;  %v315_v28 = vld [vmem:[#allocation2 + $0xb8] sm:$0xff] }
  0x26   :  { %1771 = vmatmul.mubr.msk.f32.vlgmr.msra.gmra.mxu0 %vm96_vm0, %v2331_v6  ;;  %1785 = vmatmul.mubr.msk.f32.vlgmr.msra.gmra.mxu1 %vm96_vm0, %v2336_v7  ;;  %v298_v29 = vld [vmem:[#allocation2 + $0x38] sm:$0xff]  ;;  %v314_v30 = vld [vmem:[#allocation2 + $0xb0] sm:$0xff]  ;;  %v313_v32 = vld [vmem:[#allocation2 + $0xa8] sm:$0xff] }
  0x27   :  { %1773 = vmatprep.mubr.msk.f32.mxu0 %vm96_vm0, %v2343_v8  ;;  %1787 = vmatprep.mubr.msk.f32.mxu1 %vm96_vm0, %v2348_v9  ;;  %v297_v31 = vld [vmem:[#allocation2 + $0x30] sm:$0xff]  ;;  %v296_v33 = vld [vmem:[#allocation2 + $0x28] sm:$0xff]  ;;  %v312_v34 = vld [vmem:[#allocation2 + $0xa0] sm:$0xff] }
  0x28   :  { %1790 = vmatprep.subr.mxu0 %v323_v10  ;;  %1828 = vmatprep.subr.mxu1 %v306_v11  ;;  %v295_v35 = vld [vmem:[#allocation2 + $0x20] sm:$0xff]  ;;  %v311_v36 = vld [vmem:[#allocation2 + $0x98] sm:$0xff]  ;;  %v310_v38 = vld [vmem:[#allocation2 + $0x90] sm:$0xff] }
  0x29   :  { %1791 = vmatpush3.msra.mxu0 %v323_v10  ;;  %1829 = vmatpush3.msra.mxu1 %v306_v11  ;;  %v294_v37 = vld [vmem:[#allocation2 + $0x18] sm:$0xff]  ;;  %v293_v39 = vld [vmem:[#allocation2 + $0x10] sm:$0xff]  ;;  %v309_v40 = vld [vmem:[#allocation2 + $0x88] sm:$0xff] }
  0x2a   :  { %1774 = vmatmul.mubr.msk.f32.gmra.mxu0 %vm96_vm0, %v2363_v12  ;;  %1788 = vmatmul.mubr.msk.f32.gmra.mxu1 %vm96_vm0, %v2368_v13  ;;  %v308_v41 = vld [vmem:[#allocation2 + $0x80] sm:$0xff]  ;;  %v510_v42 = vld [vmem:[#allocation2 + $0x178] sm:$0xff]  ;;  %v509_v43 = vld [vmem:[#allocation2 + $0x170] sm:$0xff] }
  0x2b   :  { %1792 = vmatprep.subr.mxu0 %v322_v14  ;;  %1822 = vmatprep.mubr.f32.mxu0 %v67_v3  ;;  %v508_v44 = vld [vmem:[#allocation2 + $0x168] sm:$0xff]  ;;  %v507_v45 = vld [vmem:[#allocation2 + $0x160] sm:$0xff]  ;;  %v506_v46 = vld [vmem:[#allocation2 + $0x158] sm:$0xff] }
  0x2c   :  { %1793 = vmatpush3.msra.mxu0 %v322_v14  ;;  %1830 = vmatprep.subr.mxu1 %v305_v15  ;;  %v505_v47 = vld [vmem:[#allocation2 + $0x150] sm:$0xff]  ;;  %v504_v48 = vld [vmem:[#allocation2 + $0x148] sm:$0xff]  ;;  %v503_v49 = vld [vmem:[#allocation2 + $0x140] sm:$0xff] }
  0x2d   :  { %1794 = vmatprep.subr.mxu0 %v321_v16  ;;  %1831 = vmatpush3.msra.mxu1 %v305_v15  ;;  %v502_v50 = vld [vmem:[#allocation2 + $0x138] sm:$0xff]  ;;  %v501_v51 = vld [vmem:[#allocation2 + $0x130] sm:$0xff]  ;;  %v500_v52 = vld [vmem:[#allocation2 + $0x128] sm:$0xff] }
  0x2e   :  { %1795 = vmatpush3.msra.mxu0 %v321_v16  ;;  %1832 = vmatprep.subr.mxu1 %v304_v17  ;;  %v499_v53 = vld [vmem:[#allocation2 + $0x120] sm:$0xff]  ;;  %v498_v54 = vld [vmem:[#allocation2 + $0x118] sm:$0xff]  ;;  %v497_v55 = vld [vmem:[#allocation2 + $0x110] sm:$0xff] }
  0x2f   :  { %1796 = vmatprep.subr.mxu0 %v320_v18  ;;  %1833 = vmatpush3.msra.mxu1 %v304_v17  ;;  %v292_v56 = vld [vmem:[#allocation2 + $0x8] sm:$0xff]  ;;  %v291_v58 = vld [vmem:[#allocation2] sm:$0xff]  ;;  %v2390_v14 = vld [vmem:[%s2651_s7 + $0x70] sm:$0xff] }
  0x30   :  { %1797 = vmatpush3.msra.mxu0 %v320_v18  ;;  %1834 = vmatprep.subr.mxu1 %v303_v19  ;;  %v496_v57 = vld [vmem:[#allocation2 + $0x108] sm:$0xff]  ;;  %v495_v59 = vld [vmem:[#allocation2 + $0x100] sm:$0xff]  ;;  %v2411_v16 = vld [vmem:[%s2651_s7 + $0x58] sm:$0xff] }
  0x31   :  { %1798 = vmatprep.subr.mxu0 %v319_v20  ;;  %1835 = vmatpush3.msra.mxu1 %v303_v19  ;;  %v2397_v15 = vld [vmem:[%s2651_s7 + $0x68] sm:$0xff]  ;;  %v2418_v17 = vld [vmem:[%s2651_s7 + $0x50] sm:$0xff]  ;;  %v2432_v19 = vld [vmem:[%s2651_s7 + $0x40] sm:$0xff] }
  0x32   :  { %1799 = vmatpush3.msra.mxu0 %v319_v20  ;;  %1836 = vmatprep.subr.mxu1 %v302_v21  ;;  %v2425_v18 = vld [vmem:[%s2651_s7 + $0x48] sm:$0xff]  ;;  %v2439_v20 = vld [vmem:[%s2651_s7 + $0x38] sm:$0xff] }
  0x33   :  { %1800 = vmatprep.subr.mxu0 %v318_v22  ;;  %1837 = vmatpush3.msra.mxu1 %v302_v21  ;;  %v2446_v21 = vld [vmem:[%s2651_s7 + $0x30] sm:$0xff] }
  0x34   :  { %1801 = vmatpush3.msra.mxu0 %v318_v22  ;;  %1838 = vmatprep.subr.mxu1 %v301_v23  ;;  %v2453_v22 = vld [vmem:[%s2651_s7 + $0x28] sm:$0xff] }
  0x35   :  { %1802 = vmatprep.subr.mxu0 %v317_v24  ;;  %1839 = vmatpush3.msra.mxu1 %v301_v23  ;;  %v2460_v23 = vld [vmem:[%s2651_s7 + $0x20] sm:$0xff] }
  0x36   :  { %1803 = vmatpush3.msra.mxu0 %v317_v24  ;;  %1840 = vmatprep.subr.mxu1 %v300_v25  ;;  %v2466_v24 = vld [vmem:[%s2651_s7 + $0x18] sm:$0xff] }
  0x37   :  { %1804 = vmatprep.subr.mxu0 %v316_v26  ;;  %1841 = vmatpush3.msra.mxu1 %v300_v25  ;;  %v2472_v25 = vld [vmem:[%s2651_s7 + $0x10] sm:$0xff] }
  0x38   :  { %1805 = vmatpush3.msra.mxu0 %v316_v26  ;;  %1842 = vmatprep.subr.mxu1 %v299_v27  ;;  %v2481_v26 = vld [vmem:[%s2651_s7 + $0x8] sm:$0xff] }
  0x39   :  { %1806 = vmatprep.subr.mxu0 %v315_v28  ;;  %1843 = vmatpush3.msra.mxu1 %v299_v27  ;;  %v2488_v27 = vld [vmem:[%s2651_s7] sm:$0xff] }
  0x3a   :  { %1807 = vmatpush3.msra.mxu0 %v315_v28  ;;  %1844 = vmatprep.subr.mxu1 %v298_v29 }
  0x3b   :  { %1808 = vmatprep.subr.mxu0 %v314_v30  ;;  %1845 = vmatpush3.msra.mxu1 %v298_v29 }
  0x3c   :  { %1809 = vmatpush3.msra.mxu0 %v314_v30  ;;  %1846 = vmatprep.subr.mxu1 %v297_v31 }
  0x3d   :  { %1810 = vmatprep.subr.mxu0 %v313_v32  ;;  %1847 = vmatpush3.msra.mxu1 %v297_v31 }
  0x3e   :  { %1811 = vmatpush3.msra.mxu0 %v313_v32  ;;  %1848 = vmatprep.subr.mxu1 %v296_v33 }
  0x3f   :  { %1812 = vmatprep.subr.mxu0 %v312_v34  ;;  %1849 = vmatpush3.msra.mxu1 %v296_v33 }
  0x40   :  { %1813 = vmatpush3.msra.mxu0 %v312_v34  ;;  %1850 = vmatprep.subr.mxu1 %v295_v35 }
  0x41   :  { %1814 = vmatprep.subr.mxu0 %v311_v36  ;;  %1851 = vmatpush3.msra.mxu1 %v295_v35 }
  0x42   :  { %1815 = vmatpush3.msra.mxu0 %v311_v36  ;;  %1852 = vmatprep.subr.mxu1 %v294_v37 }
  0x43   :  { %1816 = vmatprep.subr.mxu0 %v310_v38  ;;  %1853 = vmatpush3.msra.mxu1 %v294_v37 }
  0x44   :  { %1817 = vmatpush3.msra.mxu0 %v310_v38  ;;  %1854 = vmatprep.subr.mxu1 %v293_v39 }
  0x45   :  { %1818 = vmatprep.subr.mxu0 %v309_v40  ;;  %1855 = vmatpush3.msra.mxu1 %v293_v39 }
  0x46   :  { %1819 = vmatpush3.msra.mxu0 %v309_v40  ;;  %1856 = vmatprep.subr.mxu1 %v292_v56 }
  0x47   :  { %1820 = vmatprep.subr.mxu0 %v308_v41  ;;  %1857 = vmatpush3.msra.mxu1 %v292_v56 }
  0x48   :  { %1821 = vmatpush3.msra.mxu0 %v308_v41  ;;  %1858 = vmatprep.subr.mxu1 %v291_v58 }
  0x49   :  { %1866 = vmatprep.subr.mxu0 %v510_v42  ;;  %1823 = vmatmul.mubr.f32.vlgmr.msra.gmra.mxu0 %v2305_v2 }
  0x4a   :  { %1867 = vmatpush3.msra.mxu0 %v510_v42  ;;  %1825 = vmatprep.mubr.f32.mxu0 %v2296_v1  ;;  %v2381_v1 = vld [vmem:[%s2651_s7 + $0x78] sm:$0xff] }
  0x4b   :  { %1868 = vmatprep.subr.mxu0 %v509_v43  ;;  %1859 = vmatpush3.msra.mxu1 %v291_v58 }
  0x4c   :  { %1869 = vmatpush3.msra.mxu0 %v509_v43  ;;  %1904 = vmatprep.subr.mxu1 %v2212_v60 }
  0x4d   :  { %1870 = vmatprep.subr.mxu0 %v508_v44  ;;  %1826 = vmatmul.mubr.f32.gmra.mxu0 %v2291_v0 }
  0x4e   :  { %1871 = vmatpush3.msra.mxu0 %v508_v44 }
  0x4f   :  { %1872 = vmatprep.subr.mxu0 %v507_v45 }
  0x50   :  { %1873 = vmatpush3.msra.mxu0 %v507_v45 }
  0x51   :  { %1874 = vmatprep.subr.mxu0 %v506_v46 }
  0x52   :  { %1875 = vmatpush3.msra.mxu0 %v506_v46 }
  0x53   :  { %1876 = vmatprep.subr.mxu0 %v505_v47 }
  0x54   :  { %1877 = vmatpush3.msra.mxu0 %v505_v47 }
  0x55   :  { %1878 = vmatprep.subr.mxu0 %v504_v48 }
  0x56   :  { %1879 = vmatpush3.msra.mxu0 %v504_v48 }
  0x57   :  { %1880 = vmatprep.subr.mxu0 %v503_v49 }
  0x58   :  { %1881 = vmatpush3.msra.mxu0 %v503_v49 }
  0x59   :  { %1882 = vmatprep.subr.mxu0 %v502_v50 }
  0x5a   :  { %1883 = vmatpush3.msra.mxu0 %v502_v50 }
  0x5b   :  { %1884 = vmatprep.subr.mxu0 %v501_v51 }
  0x5c   :  { %1885 = vmatpush3.msra.mxu0 %v501_v51 }
  0x5d   :  { %1886 = vmatprep.subr.mxu0 %v500_v52 }
  0x5e   :  { %1887 = vmatpush3.msra.mxu0 %v500_v52 }
  0x5f   :  { %1888 = vmatprep.subr.mxu0 %v499_v53 }
  0x60   :  { %1889 = vmatpush3.msra.mxu0 %v499_v53 }
  0x61   :  { %1890 = vmatprep.subr.mxu0 %v498_v54 }
  0x62   :  { %1891 = vmatpush3.msra.mxu0 %v498_v54 }
  0x63   :  { %1892 = vmatprep.subr.mxu0 %v497_v55 }
  0x64   :  { %1893 = vmatpush3.msra.mxu0 %v497_v55 }
  0x65   :  { %1894 = vmatprep.subr.mxu0 %v496_v57 }
  0x66   :  { %1895 = vmatpush3.msra.mxu0 %v496_v57 }
  0x67   :  { %1896 = vmatprep.subr.mxu0 %v495_v59 }
  0x68   :  { %1897 = vmatpush3.msra.mxu0 %v495_v59 }
  0xe6   :  { %v1772_v61 = vpop.f32.mrf.mxu0  ;;  %v1786_v62 = vpop.f32.mrf.mxu1 }
  0xe8   :  { %v175_v63 = vpop.f32.mrf.mxu0  ;;  %v272_v0 = vpop.f32.mrf.mxu1 }
  0xe9   :  { %1860 = vmatprep.mubr.f32.mxu1 %v175_v63  ;;  %1898 = vmatprep.mubr.f32.mxu0 %v272_v0 }
  0xea   :  { %v1775_v2 = vpop.f32.mrf.mxu0  ;;  %v1789_v3 = vpop.f32.mrf.mxu1  ;;  %1861 = vmatmul.mubr.f32.vlgmr.msra.gmra.mxu1 %v1772_v61  ;;  %1899 = vmatmul.mubr.f32.vlgmr.msra.gmra.mxu0 %v1786_v62 }
  0xeb   :  { %1905 = vmatpush3.msra.mxu1 %v2381_v1 }
  0xec   :  { %v185_v10 = vpop.f32.mrf.mxu0  ;;  %v282_v11 = vpop.f32.mrf.mxu1  ;;  %1906 = vmatprep.subr.mxu1 %v2212_v60 }
  0xed   :  { %1863 = vmatprep.mubr.f32.mxu1 %v185_v10  ;;  %1901 = vmatprep.mubr.f32.mxu0 %v282_v11 }
  0xee   :  { %1864 = vmatmul.mubr.f32.gmra.mxu1 %v1775_v2  ;;  %1902 = vmatmul.mubr.f32.gmra.mxu0 %v1789_v3 }
  0xef   :  { %1952 = vmatprep.mubr.msk.f32.mxu0 %vm96_vm0, %v2319_v4  ;;  %1907 = vmatpush3.msra.mxu1 %v2390_v14  ;;  %v2404_v4 = vld [vmem:[%s2651_s7 + $0x60] sm:$0xff] }
  0xf0   :  { %1908 = vmatprep.subr.mxu1 %v2212_v60  ;;  %1936 = vmatprep.mubr.msk.f32.mxu1 %vm2213_vm1, %v2212_v60 }
  0xf1   :  { %1909 = vmatpush3.msra.mxu1 %v2397_v15 }
  0xf2   :  { %1910 = vmatprep.subr.mxu1 %v2212_v60 }
  0xf3   :  { %1911 = vmatpush3.msra.mxu1 %v2404_v4 }
  0xf4   :  { %1912 = vmatprep.subr.mxu1 %v2212_v60 }
  0xf5   :  { %1913 = vmatpush3.msra.mxu1 %v2411_v16 }
  0xf6   :  { %1914 = vmatprep.subr.mxu1 %v2212_v60 }
  0xf7   :  { %1915 = vmatpush3.msra.mxu1 %v2418_v17 }
  0xf8   :  { %1916 = vmatprep.subr.mxu1 %v2212_v60 }
  0xf9   :  { %1917 = vmatpush3.msra.mxu1 %v2425_v18 }
  0xfa   :  { %1918 = vmatprep.subr.mxu1 %v2212_v60 }
  0xfb   :  { %1919 = vmatpush3.msra.mxu1 %v2432_v19 }
  0xfc   :  { %1920 = vmatprep.subr.mxu1 %v2212_v60 }
  0xfd   :  { %1921 = vmatpush3.msra.mxu1 %v2439_v20 }
  0xfe   :  { %1922 = vmatprep.subr.mxu1 %v2212_v60 }
  0xff   :  { %1923 = vmatpush3.msra.mxu1 %v2446_v21 }
 0x100   :  { %1924 = vmatprep.subr.mxu1 %v2212_v60 }
 0x101   :  { %1925 = vmatpush3.msra.mxu1 %v2453_v22 }
 0x102   :  { %1926 = vmatprep.subr.mxu1 %v2212_v60 }
 0x103   :  { %1927 = vmatpush3.msra.mxu1 %v2460_v23 }
 0x104   :  { %1928 = vmatprep.subr.mxu1 %v2212_v60 }
 0x105   :  { %1929 = vmatpush3.msra.mxu1 %v2466_v24 }
 0x106   :  { %1930 = vmatprep.subr.mxu1 %v2212_v60 }
 0x107   :  { %1931 = vmatpush3.msra.mxu1 %v2472_v25 }
 0x108   :  { %1932 = vmatprep.subr.mxu1 %v2212_v60 }
 0x109   :  { %1933 = vmatpush3.msra.mxu1 %v2481_v26  ;;  %v1824_v28 = vpop.f32.mrf.mxu0 }
 0x10a   :  { %1934 = vmatprep.subr.mxu1 %v2212_v60 }
 0x10b   :  { %1935 = vmatpush3.msra.mxu1 %v2488_v27  ;;  %v390_v29 = vpop.f32.mrf.mxu0 }
 0x10c   :  { %1939 = vmatprep.subr.mxu1 %v2212_v60 }
 0x10d   :  { %v1827_v30 = vpop.f32.mrf.mxu0 }
 0x10f   :  { %v400_v31 = vpop.f32.mrf.mxu0 }
 0x1aa   :  { %v1862_v32 = vpop.f32.mrf.mxu1  ;;  %v1900_v33 = vpop.f32.mrf.mxu0 }
 0x1ab   :  { %v481_v34 = vadd.f32 %v1862_v32, %v1824_v28 }
 0x1ac   :  { %v475_v35 = vpop.f32.mrf.mxu1  ;;  %v577_v36 = vpop.f32.mrf.mxu0 }
 0x1ad   :  { %v476_v37 = vadd.f32 %v475_v35, %v390_v29  ;;  %v2494_v40 = vadd.f32 %v1900_v33, %v481_v34 }
 0x1ae   :  { %v1865_v38 = vpop.f32.mrf.mxu1  ;;  %v1903_v39 = vpop.f32.mrf.mxu0 }
 0x1af   :  { %v2496_v41 = vadd.f32 %v577_v36, %v476_v37  ;;  %v491_v42 = vadd.f32 %v1865_v38, %v1827_v30  ;;  %v612_v47 = vmul.f32 %v2494_v40, %v2494_v40 }
 0x1b0   :  { %v485_v43 = vpop.f32.mrf.mxu1  ;;  %v587_v46 = vpop.f32.mrf.mxu0 }
 0x1b1   :  { %v611_v44 = vmul.f32 %v2496_v41, %v2496_v41  ;;  %v486_v45 = vadd.f32 %v485_v43, %v400_v31  ;;  %v602_v48 = vadd.f32 %v2494_v40, %v2496_v41  ;;  %v599_v49 = vadd.f32 %v1903_v39, %v491_v42  ;;  %v2510_v31 = vld [vmem:[%s2652_s8] sm:$0xff] }
 0x1b2   :  { %v2214_v39 = vmov 1966171168   ;;  %v709_v43 = vlaneseq }
 0x1b3   :  { %v598_v50 = vadd.f32 %v587_v46, %v486_v45  ;;  %v615_v51 = vadd.f32 %v612_v47, %v611_v44  ;;  %v614_v54 = vmul.f32 %v599_v49, %v599_v49  ;;  %v707_v42 = vunpack.c.l.s4 %v2214_v39  ;;  %v1008_v39 = vld [vmem:[#allocation5 + $0x60] sm:$0xff] }
 0x1b4   :  { %v2513_v45 = vshrl.u32 %v709_v43, 7  ;;  %v1006_v43 = vld [vmem:[#allocation5 + $0x50] sm:$0xff] }
 0x1b5   :  { %v603_v52 = vadd.f32 %v602_v48, %v598_v50  ;;  %v613_v53 = vmul.f32 %v598_v50, %v598_v50  ;;  %v708_v44 = vunpack.c.0.s8 %v707_v42  ;;  %v1021_v42 = vld [vmem:[#allocation5 + $0xc0] sm:$0xff] }
 0x1b7   :  { %v604_v55 = vadd.f32 %v603_v52, %v599_v49  ;;  %v616_v56 = vadd.f32 %v615_v51, %v613_v53  ;;  %v2516_v46 = vsub.s32 %v708_v44, %v2513_v45  ;;  %v600_v52 = vld [vmem:[%s2647_s3] sm:$0x1]  ;;  %v1020_v44 = vld [vmem:[#allocation5 + $0xb8] sm:$0xff] }
 0x1b9   :  { %v605_v57 = vrot.slane %v604_v55, 4  ;;  %v617_v58 = vadd.f32 %v616_v56, %v614_v54 }
 0x1bb   :  { %v606_v59 = vadd.f32 %v605_v57, %v604_v55  ;;  %v618_v61 = vrot.slane %v617_v58, 4  ;;  %v601_v55 = vld [vmem:[%s2648_s4] sm:$0x1]  ;;  %v2527_v57 = vsub.s32 0, %v2513_v45 }
 0x1bd   :  { %v607_v62 = vrot.slane %v606_v59, 2  ;;  %v619_v63 = vadd.f32 %v618_v61, %v617_v58 }
 0x1bf   :  { %v608_v0 = vadd.f32 %v607_v62, %v606_v59  ;;  %v620_v2 = vrot.slane %v619_v63, 2  ;;  %v816_v62 = vsub.s32 1, %v2513_v45  ;;  %v2139_v45 = vld [vmem:[%s2644_s0 + $0x8] sm:$0xff] }
 0x1c1   :  { %v609_v3 = vrot.slane %v608_v0, 1  ;;  %v621_v10 = vadd.f32 %v620_v2, %v619_v63 }
 0x1c3   :  { %v622_v11 = vrot.slane %v621_v10, 1  ;;  %v610_v28 = vadd.f32 %v609_v3, %v608_v0 }
 0x1c5   :  { %v623_v29 = vadd.f32 %v622_v11, %v621_v10 }
 0x1c7   :  { %v625_v30 = vsel %vm624_vm2, %v610_v28, %v623_v29 }
 0x1c8   :  { %1937 = vmatmul.mubr.f32.vlgmr.msra.gmra.mxu1 %v625_v30 }
 0x1c9   :  { %1941 = vmatprep.mubr.msk.f32.mxu1 %vm2213_vm1, %v2212_v60  ;;  %1940 = vmatpush3.msra.mxu1 %v2510_v31 }
 0x288   :  { %v692_v32 = vpop.f32.mrf.mxu1 }
 0x289   :  { %v697_v33 = vmul.f32 0.001953125, %v692_v32 }
 0x28a   :  { %v1938_v34 = vpop.f32.mrf.mxu1 }
 0x28b   :  { %v698_v35 = vmul.f32 %v697_v33, %v697_v33 }
 0x28d   :  { %v700_v36 = vrot.slane %v698_v35, 7 }
 0x28f   :  { %v702_v37 = vsub.f32 %v697_v33, %v700_v36  ;;  %v1011_v36 = vld [vmem:[#allocation5 + $0x78] sm:$0xff] }
 0x291   :  { %v703_v38 = vadd.f32 1e-05, %v702_v37  ;;  %v1026_v37 = vld [vmem:[#allocation5 + $0xe8] sm:$0xff] }
 0x293   :  { %2134 = vrsqrt.f32 %v703_v38  ;;  %v1009_v38 = vld [vmem:[#allocation5 + $0x68] sm:$0xff] }
 0x2a0   :  { %v2135_v47 = vpop.eup %2134 }
 0x2a1   :  { %v712_v48 = vrot.slane %v2135_v47, %v2516_v46  ;;  %v1005_v47 = vld [vmem:[#allocation5 + $0x48] sm:$0xff] }
 0x2a3   :  { %v713_v51 = vcombine.high %v712_v48, %v712_v48  ;;  %v1019_v48 = vld [vmem:[#allocation5 + $0xb0] sm:$0xff] }
 0x2a5   :  { %v720_v53 = vrot.slane %v713_v51, %v2516_v46  ;;  %v1004_v51 = vld [vmem:[#allocation5 + $0x40] sm:$0xff] }
 0x2a7   :  { %v722_v54 = vmul.f32 %v720_v53, %v600_v52  ;;  %v1018_v52 = vld [vmem:[#allocation5 + $0xa8] sm:$0xff]  ;;  %v1003_v53 = vld [vmem:[#allocation5 + $0x38] sm:$0xff] }
 0x2a9   :  { %v723_v56 = vmul.f32 %v722_v54, %v697_v33 }
 0x2ab   :  { %v724_v58 = vsub.f32 %v601_v55, %v723_v56  ;;  %v1002_v55 = vld [vmem:[#allocation5 + $0x30] sm:$0xff]  ;;  %v1016_v56 = vld [vmem:[#allocation5 + $0x98] sm:$0xff] }
 0x2ad   :  { %v729_v59 = vrot.slane %v724_v58, %v2527_v57  ;;  %v1001_v58 = vld [vmem:[#allocation5 + $0x28] sm:$0xff] }
 0x2af   :  { %v731_v61 = vsel %vm624_vm2, %v722_v54, %v729_v59  ;;  %v1017_v54 = vld [vmem:[#allocation5 + $0xa0] sm:$0xff]  ;;  %v1015_v59 = vld [vmem:[#allocation5 + $0x90] sm:$0xff] }
 0x2b0   :  { %1942 = vmatmul.mubr.msk.f32.vlgmr.msra.gmra.mxu1 %vm732_vm3, %v731_v61  ;;  %v1000_v61 = vld [vmem:[#allocation5 + $0x20] sm:$0xff] }
 0x2b1   :  { %1966 = vmatprep.mubr.msk.f32.mxu1 %vm96_vm0, %v2326_v5 }
 0x370   :  { %v802_v63 = vpop.f32.mrf.mxu1 }
 0x371   :  { %v809_v0 = vrot.slane %v802_v63, %v2527_v57  ;;  %v817_v28 = vrot.slane %v802_v63, %v816_v62  ;;  %v1014_v63 = vld [vmem:[#allocation5 + $0x88] sm:$0xff] }
 0x372   :  { %v1943_v2 = vpop.f32.mrf.mxu1 }
 0x373   :  { %v811_v3 = vmul.f32 %v809_v0, %v2494_v40  ;;  %v812_v10 = vmul.f32 %v809_v0, %v598_v50  ;;  %v813_v11 = vmul.f32 %v809_v0, %v599_v49  ;;  %v810_v29 = vmul.f32 %v809_v0, %v2496_v41  ;;  %v1028_v49 = vld [vmem:[#allocation5 + $0xf8] sm:$0xff]  ;;  %v1027_v50 = vld [vmem:[#allocation5 + $0xf0] sm:$0xff]  ;;  %v1013_v2 = vld [vmem:[#allocation5 + $0x80] sm:$0xff] }
 0x374   :  { %v999_v0 = vld [vmem:[#allocation5 + $0x18] sm:$0xff] }
 0x375   :  { %v820_v30 = vadd.f32 %v817_v28, %v812_v10  ;;  %v821_v32 = vadd.f32 %v817_v28, %v813_v11  ;;  %v819_v33 = vadd.f32 %v817_v28, %v811_v3  ;;  %v818_v5 = vadd.f32 %v817_v28, %v810_v29  ;;  %v998_v3 = vld [vmem:[#allocation5 + $0x10] sm:$0xff]  ;;  %v1215_v10 = vld [vmem:[#allocation5 + $0x178] sm:$0xff]  ;;  %v1213_v28 = vld [vmem:[#allocation5 + $0x168] sm:$0xff] }
 0x376   :  { %v1214_v11 = vld [vmem:[#allocation5 + $0x170] sm:$0xff]  ;;  %v1212_v29 = vld [vmem:[#allocation5 + $0x160] sm:$0xff] }
 0x377   :  { %v2540_v34 = vmax.f32 %v821_v32, 0.0  ;;  %v2542_v35 = vmax.f32 %v820_v30, 0.0  ;;  %v2548_v40 = vmax.f32 %v819_v33, 0.0  ;;  %v822_v41 = vmax.f32 %v818_v5, 0.0  ;;  %v1211_v30 = vld [vmem:[#allocation5 + $0x158] sm:$0xff]  ;;  %v1210_v32 = vld [vmem:[#allocation5 + $0x150] sm:$0xff] }
 0x378   :  { %v1209_v33 = vld [vmem:[#allocation5 + $0x148] sm:$0xff]  ;;  %v1208_v5 = vld [vmem:[#allocation5 + $0x140] sm:$0xff] }
 0x379   :  { %1944 = vmatprep.subr.mxu0 %v2540_v34  ;;  %1958 = vmatprep.subr.mxu1 %v2540_v34 }
 0x37a   :  { %1945 = vmatpush3.msra.mxu0 %v2540_v34  ;;  %1959 = vmatpush3.msra.mxu1 %v2540_v34 }
 0x37b   :  { %1946 = vmatprep.subr.mxu0 %v2542_v35  ;;  %1960 = vmatprep.subr.mxu1 %v2542_v35 }
 0x37c   :  { %1947 = vmatpush3.msra.mxu0 %v2542_v35  ;;  %1961 = vmatpush3.msra.mxu1 %v2542_v35 }
 0x37d   :  { %1948 = vmatprep.subr.mxu0 %v2548_v40  ;;  %1962 = vmatprep.subr.mxu1 %v2548_v40 }
 0x37e   :  { %1949 = vmatpush3.msra.mxu0 %v2548_v40  ;;  %1963 = vmatpush3.msra.mxu1 %v2548_v40 }
 0x37f   :  { %1950 = vmatprep.subr.mxu0 %v822_v41  ;;  %1964 = vmatprep.subr.mxu1 %v822_v41 }
 0x380   :  { %1951 = vmatpush3.msra.mxu0 %v822_v41  ;;  %1965 = vmatpush3.msra.mxu1 %v822_v41 }
 0x381   :  { %1953 = vmatmul.mubr.msk.f32.vlgmr.msra.gmra.mxu0 %vm96_vm0, %v2331_v6  ;;  %1967 = vmatmul.mubr.msk.f32.vlgmr.msra.gmra.mxu1 %vm96_vm0, %v2336_v7  ;;  %v1025_v6 = vld [vmem:[#allocation5 + $0xe0] sm:$0xff]  ;;  %v1010_v7 = vld [vmem:[#allocation5 + $0x70] sm:$0xff] }
 0x382   :  { %1972 = vmatprep.subr.mxu0 %v1028_v49  ;;  %1955 = vmatprep.mubr.msk.f32.mxu0 %vm96_vm0, %v2343_v8  ;;  %v1024_v8 = vld [vmem:[#allocation5 + $0xd8] sm:$0xff] }
 0x383   :  { %1973 = vmatpush3.msra.mxu0 %v1028_v49  ;;  %1969 = vmatprep.mubr.msk.f32.mxu1 %vm96_vm0, %v2348_v9  ;;  %v1023_v9 = vld [vmem:[#allocation5 + $0xd0] sm:$0xff]  ;;  %v1203_v49 = vld [vmem:[#allocation5 + $0x118] sm:$0xff] }
 0x384   :  { %1974 = vmatprep.subr.mxu0 %v1027_v50  ;;  %2010 = vmatprep.subr.mxu1 %v1011_v36 }
 0x385   :  { %1975 = vmatpush3.msra.mxu0 %v1027_v50  ;;  %1970 = vmatmul.mubr.msk.f32.gmra.mxu1 %vm96_vm0, %v2368_v13  ;;  %v1022_v13 = vld [vmem:[#allocation5 + $0xc8] sm:$0xff]  ;;  %v1202_v50 = vld [vmem:[#allocation5 + $0x110] sm:$0xff] }
 0x386   :  { %1956 = vmatmul.mubr.msk.f32.gmra.mxu0 %vm96_vm0, %v2363_v12  ;;  %1976 = vmatprep.subr.mxu0 %v1026_v37  ;;  %v1007_v12 = vld [vmem:[#allocation5 + $0x58] sm:$0xff] }
 0x387   :  { %1977 = vmatpush3.msra.mxu0 %v1026_v37  ;;  %2004 = vmatprep.mubr.f32.mxu0 %v822_v41  ;;  %v1204_v41 = vld [vmem:[#allocation5 + $0x120] sm:$0xff]  ;;  %v1201_v37 = vld [vmem:[#allocation5 + $0x108] sm:$0xff] }
 0x388   :  { %1978 = vmatprep.subr.mxu0 %v1025_v6  ;;  %2011 = vmatpush3.msra.mxu1 %v1011_v36  ;;  %v997_v36 = vld [vmem:[#allocation5 + $0x8] sm:$0xff] }
 0x389   :  { %1979 = vmatpush3.msra.mxu0 %v1025_v6  ;;  %2012 = vmatprep.subr.mxu1 %v1010_v7  ;;  %v996_v6 = vld [vmem:[#allocation5] sm:$0xff] }
 0x38a   :  { %1980 = vmatprep.subr.mxu0 %v1024_v8  ;;  %2013 = vmatpush3.msra.mxu1 %v1010_v7  ;;  %v1200_v7 = vld [vmem:[#allocation5 + $0x100] sm:$0xff] }
 0x38b   :  { %1981 = vmatpush3.msra.mxu0 %v1024_v8  ;;  %2014 = vmatprep.subr.mxu1 %v1009_v38 }
 0x38c   :  { %1982 = vmatprep.subr.mxu0 %v1023_v9  ;;  %2015 = vmatpush3.msra.mxu1 %v1009_v38 }
 0x38d   :  { %1983 = vmatpush3.msra.mxu0 %v1023_v9  ;;  %2016 = vmatprep.subr.mxu1 %v1008_v39 }
 0x38e   :  { %1984 = vmatprep.subr.mxu0 %v1022_v13  ;;  %2017 = vmatpush3.msra.mxu1 %v1008_v39 }
 0x38f   :  { %1985 = vmatpush3.msra.mxu0 %v1022_v13  ;;  %2018 = vmatprep.subr.mxu1 %v1007_v12 }
 0x390   :  { %1986 = vmatprep.subr.mxu0 %v1021_v42  ;;  %2019 = vmatpush3.msra.mxu1 %v1007_v12 }
 0x391   :  { %1987 = vmatpush3.msra.mxu0 %v1021_v42  ;;  %2020 = vmatprep.subr.mxu1 %v1006_v43 }
 0x392   :  { %1988 = vmatprep.subr.mxu0 %v1020_v44  ;;  %2021 = vmatpush3.msra.mxu1 %v1006_v43 }
 0x393   :  { %1989 = vmatpush3.msra.mxu0 %v1020_v44  ;;  %2022 = vmatprep.subr.mxu1 %v1005_v47 }
 0x394   :  { %1990 = vmatprep.subr.mxu0 %v1019_v48  ;;  %2023 = vmatpush3.msra.mxu1 %v1005_v47 }
 0x395   :  { %1991 = vmatpush3.msra.mxu0 %v1019_v48  ;;  %2024 = vmatprep.subr.mxu1 %v1004_v51 }
 0x396   :  { %1992 = vmatprep.subr.mxu0 %v1018_v52  ;;  %2025 = vmatpush3.msra.mxu1 %v1004_v51 }
 0x397   :  { %1993 = vmatpush3.msra.mxu0 %v1018_v52  ;;  %2026 = vmatprep.subr.mxu1 %v1003_v53 }
 0x398   :  { %1994 = vmatprep.subr.mxu0 %v1017_v54  ;;  %2027 = vmatpush3.msra.mxu1 %v1003_v53 }
 0x399   :  { %1995 = vmatpush3.msra.mxu0 %v1017_v54  ;;  %2028 = vmatprep.subr.mxu1 %v1002_v55 }
 0x39a   :  { %1996 = vmatprep.subr.mxu0 %v1016_v56  ;;  %2029 = vmatpush3.msra.mxu1 %v1002_v55 }
 0x39b   :  { %1997 = vmatpush3.msra.mxu0 %v1016_v56  ;;  %2030 = vmatprep.subr.mxu1 %v1001_v58 }
 0x39c   :  { %1998 = vmatprep.subr.mxu0 %v1015_v59  ;;  %2031 = vmatpush3.msra.mxu1 %v1001_v58 }
 0x39d   :  { %1999 = vmatpush3.msra.mxu0 %v1015_v59  ;;  %2032 = vmatprep.subr.mxu1 %v1000_v61 }
 0x39e   :  { %2000 = vmatprep.subr.mxu0 %v1014_v63  ;;  %2033 = vmatpush3.msra.mxu1 %v1000_v61 }
 0x39f   :  { %2001 = vmatpush3.msra.mxu0 %v1014_v63  ;;  %2034 = vmatprep.subr.mxu1 %v999_v0 }
 0x3a0   :  { %2002 = vmatprep.subr.mxu0 %v1013_v2  ;;  %2035 = vmatpush3.msra.mxu1 %v999_v0 }
 0x3a1   :  { %2003 = vmatpush3.msra.mxu0 %v1013_v2  ;;  %2036 = vmatprep.subr.mxu1 %v998_v3 }
 0x3a2   :  { %2005 = vmatmul.mubr.f32.vlgmr.msra.gmra.mxu0 %v2548_v40  ;;  %2048 = vmatprep.subr.mxu0 %v1215_v10  ;;  %v1206_v40 = vld [vmem:[#allocation5 + $0x130] sm:$0xff] }
 0x3a3   :  { %2007 = vmatprep.mubr.f32.mxu0 %v2542_v35  ;;  %2049 = vmatpush3.msra.mxu0 %v1215_v10  ;;  %v1207_v35 = vld [vmem:[#allocation5 + $0x138] sm:$0xff] }
 0x3a4   :  { %2050 = vmatprep.subr.mxu0 %v1214_v11  ;;  %2037 = vmatpush3.msra.mxu1 %v998_v3 }
 0x3a5   :  { %2051 = vmatpush3.msra.mxu0 %v1214_v11  ;;  %2038 = vmatprep.subr.mxu1 %v997_v36 }
 0x3a6   :  { %2008 = vmatmul.mubr.f32.gmra.mxu0 %v2540_v34  ;;  %2052 = vmatprep.subr.mxu0 %v1213_v28  ;;  %v1205_v34 = vld [vmem:[#allocation5 + $0x128] sm:$0xff] }
 0x3a7   :  { %2053 = vmatpush3.msra.mxu0 %v1213_v28  ;;  %2039 = vmatpush3.msra.mxu1 %v997_v36 }
 0x3a8   :  { %2054 = vmatprep.subr.mxu0 %v1212_v29  ;;  %2040 = vmatprep.subr.mxu1 %v996_v6 }
 0x3a9   :  { %2055 = vmatpush3.msra.mxu0 %v1212_v29  ;;  %2041 = vmatpush3.msra.mxu1 %v996_v6 }
 0x3aa   :  { %2056 = vmatprep.subr.mxu0 %v1211_v30  ;;  %2086 = vmatprep.subr.mxu1 %v2212_v60 }
 0x3ab   :  { %2057 = vmatpush3.msra.mxu0 %v1211_v30 }
 0x3ac   :  { %2058 = vmatprep.subr.mxu0 %v1210_v32 }
 0x3ad   :  { %2059 = vmatpush3.msra.mxu0 %v1210_v32 }
 0x3ae   :  { %2060 = vmatprep.subr.mxu0 %v1209_v33 }
 0x3af   :  { %2061 = vmatpush3.msra.mxu0 %v1209_v33 }
 0x3b0   :  { %2062 = vmatprep.subr.mxu0 %v1208_v5 }
 0x3b1   :  { %2063 = vmatpush3.msra.mxu0 %v1208_v5 }
 0x3b2   :  { %2064 = vmatprep.subr.mxu0 %v1207_v35 }
 0x3b3   :  { %2065 = vmatpush3.msra.mxu0 %v1207_v35 }
 0x3b4   :  { %2066 = vmatprep.subr.mxu0 %v1206_v40 }
 0x3b5   :  { %2067 = vmatpush3.msra.mxu0 %v1206_v40 }
 0x3b6   :  { %2068 = vmatprep.subr.mxu0 %v1205_v34 }
 0x3b7   :  { %2069 = vmatpush3.msra.mxu0 %v1205_v34 }
 0x3b8   :  { %2070 = vmatprep.subr.mxu0 %v1204_v41 }
 0x3b9   :  { %2071 = vmatpush3.msra.mxu0 %v1204_v41 }
 0x3ba   :  { %2072 = vmatprep.subr.mxu0 %v1203_v49 }
 0x3bb   :  { %2073 = vmatpush3.msra.mxu0 %v1203_v49 }
 0x3bc   :  { %2074 = vmatprep.subr.mxu0 %v1202_v50 }
 0x3bd   :  { %2075 = vmatpush3.msra.mxu0 %v1202_v50 }
 0x3be   :  { %2076 = vmatprep.subr.mxu0 %v1201_v37 }
 0x3bf   :  { %2077 = vmatpush3.msra.mxu0 %v1201_v37 }
 0x3c0   :  { %2078 = vmatprep.subr.mxu0 %v1200_v7 }
 0x3c1   :  { %2079 = vmatpush3.msra.mxu0 %v1200_v7 }
 0x3c2   :  { %2121 = vmatprep.subr.mxu0 %v2212_v60 }
 0x441   :  { %v1954_v8 = vpop.f32.mrf.mxu0  ;;  %v1968_v38 = vpop.f32.mrf.mxu1 }
 0x443   :  { %v892_v9 = vpop.f32.mrf.mxu0  ;;  %v977_v39 = vpop.f32.mrf.mxu1 }
 0x444   :  { %2042 = vmatprep.mubr.f32.mxu1 %v892_v9  ;;  %2080 = vmatprep.mubr.f32.mxu0 %v977_v39 }
 0x445   :  { %v1971_v13 = vpop.f32.mrf.mxu1  ;;  %2043 = vmatmul.mubr.f32.vlgmr.msra.gmra.mxu1 %v1954_v8  ;;  %2081 = vmatmul.mubr.f32.vlgmr.msra.gmra.mxu0 %v1968_v38  ;;  %v1305_v38 = vld [vmem:[%s2649_s5] sm:$0x1]  ;;  %s2215_s5 = smov [#allocation7]  }
 0x446   :  { %v1957_v12 = vpop.f32.mrf.mxu0  ;;  %2087 = vmatpush3.msra.mxu1 %v2381_v1  ;;  %2122 = vmatpush3.msra.mxu0 %v2510_v31 }
 0x447   :  { %v987_v42 = vpop.f32.mrf.mxu1  ;;  %2088 = vmatprep.subr.mxu1 %v2212_v60 }
 0x448   :  { %v902_v43 = vpop.f32.mrf.mxu0  ;;  %2083 = vmatprep.mubr.f32.mxu0 %v987_v42  ;;  %2089 = vmatpush3.msra.mxu1 %v2390_v14 }
 0x449   :  { %2045 = vmatprep.mubr.f32.mxu1 %v902_v43  ;;  %2084 = vmatmul.mubr.f32.gmra.mxu0 %v1971_v13  ;;  %v1306_v13 = vld [vmem:[%s2650_s6] sm:$0x1]  ;;  %s1541_s6 = sshll.u32 %s2215_s5, 4  ;;  %s1542_s6 = int_to_ptr.vmem [resolvable:$true] %s1541_s6 }
 0x44a   :  { %2046 = vmatmul.mubr.f32.gmra.mxu1 %v1957_v12  ;;  %2090 = vmatprep.subr.mxu1 %v2212_v60  ;;  %s2182_s15 = scalar_lea.vmem %s1542_s6, 512  ;;  %p2187_p11 = scmp.lt.s32.totalorder %s1542_s6, %s1542_s6 }
 0x44b   :  { %2091 = vmatpush3.msra.mxu1 %v2397_v15  ;;  %2118 = vmatprep.mubr.msk.f32.mxu1 %vm2213_vm1, %v2212_v60  ;;  %p2183_p10 = scmp.ne.s32.totalorder %s1542_s6, %s2182_s15  ;;  %p2188_p12 = scmp.lt.s32.totalorder %s2182_s15, %s2182_s15 }
 0x44c   :  { %2092 = vmatprep.subr.mxu1 %v2212_v60  ;;  %2123 = vmatprep.mubr.msk.f32.mxu0 %vm2213_vm1, %v2212_v60 }
 0x44d   :  { %2093 = vmatpush3.msra.mxu1 %v2404_v4  ;;  %p2189_p13 = por %p2188_p12, %p2187_p11 }
 0x44e   :  { %2094 = vmatprep.subr.mxu1 %v2212_v60 }
 0x44f   :  { %2095 = vmatpush3.msra.mxu1 %v2411_v16  ;;  %p2190_p0 = pnand %p2189_p13, %p2183_p10 }
 0x450   :  { %2096 = vmatprep.subr.mxu1 %v2212_v60 }
 0x451   :  { %2097 = vmatpush3.msra.mxu1 %v2418_v17 }
 0x452   :  { %2098 = vmatprep.subr.mxu1 %v2212_v60 }
 0x453   :  { %2099 = vmatpush3.msra.mxu1 %v2425_v18 }
 0x454   :  { %2100 = vmatprep.subr.mxu1 %v2212_v60 }
 0x455   :  { %2101 = vmatpush3.msra.mxu1 %v2432_v19 }
 0x456   :  { %2102 = vmatprep.subr.mxu1 %v2212_v60 }
 0x457   :  { %2103 = vmatpush3.msra.mxu1 %v2439_v20 }
 0x458   :  { %2104 = vmatprep.subr.mxu1 %v2212_v60 }
 0x459   :  { %2105 = vmatpush3.msra.mxu1 %v2446_v21 }
 0x45a   :  { %2106 = vmatprep.subr.mxu1 %v2212_v60 }
 0x45b   :  { %2107 = vmatpush3.msra.mxu1 %v2453_v22 }
 0x45c   :  { %2108 = vmatprep.subr.mxu1 %v2212_v60 }
 0x45d   :  { %2109 = vmatpush3.msra.mxu1 %v2460_v23 }
 0x45e   :  { %2110 = vmatprep.subr.mxu1 %v2212_v60 }
 0x45f   :  { %2111 = vmatpush3.msra.mxu1 %v2466_v24 }
 0x460   :  { %2112 = vmatprep.subr.mxu1 %v2212_v60 }
 0x461   :  { %2113 = vmatpush3.msra.mxu1 %v2472_v25 }
 0x462   :  { %2114 = vmatprep.subr.mxu1 %v2212_v60  ;;  %v2006_v1 = vpop.f32.mrf.mxu0 }
 0x463   :  { %2115 = vmatpush3.msra.mxu1 %v2481_v26 }
 0x464   :  { %2116 = vmatprep.subr.mxu1 %v2212_v60  ;;  %v1095_v14 = vpop.f32.mrf.mxu0 }
 0x465   :  { %2117 = vmatpush3.msra.mxu1 %v2488_v27 }
 0x466   :  { %v2009_v15 = vpop.f32.mrf.mxu0 }
 0x468   :  { %v1105_v4 = vpop.f32.mrf.mxu0 }
 0x505   :  { %v2044_v16 = vpop.f32.mrf.mxu1  ;;  %v2082_v17 = vpop.f32.mrf.mxu0 }
 0x506   :  { %v1186_v18 = vadd.f32 %v2044_v16, %v2006_v1 }
 0x507   :  { %v1180_v19 = vpop.f32.mrf.mxu1  ;;  %v1282_v20 = vpop.f32.mrf.mxu0 }
 0x508   :  { %v1181_v21 = vadd.f32 %v1180_v19, %v1095_v14  ;;  %v1302_v25 = vadd.f32 %v2082_v17, %v1186_v18 }
 0x509   :  { %v2085_v24 = vpop.f32.mrf.mxu0 }
 0x50a   :  { %v1301_v22 = vadd.f32 %v1282_v20, %v1181_v21  ;;  %v2047_v23 = vpop.f32.mrf.mxu1  ;;  %v1317_v27 = vmul.f32 %v1302_v25, %v1302_v25 }
 0x50b   :  { %v1196_v31 = vadd.f32 %v2047_v23, %v2009_v15  ;;  %v1292_v47 = vpop.f32.mrf.mxu0 }
 0x50c   :  { %v1190_v26 = vpop.f32.mrf.mxu1  ;;  %v1316_v44 = vmul.f32 %v1301_v22, %v1301_v22  ;;  %v1307_v48 = vadd.f32 %v1302_v25, %v1301_v22 }
 0x50d   :  { %v1191_v60 = vadd.f32 %v1190_v26, %v1105_v4  ;;  %v1304_v51 = vadd.f32 %v2085_v24, %v1196_v31  ;;  %v2138_v31 = vld [vmem:[%s2644_s0] sm:$0xff] }
 0x50e   :  { %v1320_v53 = vadd.f32 %v1317_v27, %v1316_v44 }
 0x50f   :  { %v1303_v52 = vadd.f32 %v1292_v47, %v1191_v60  ;;  %v1319_v56 = vmul.f32 %v1304_v51, %v1304_v51 }
 0x511   :  { %v1308_v54 = vadd.f32 %v1307_v48, %v1303_v52  ;;  %v1318_v55 = vmul.f32 %v1303_v52, %v1303_v52 }
 0x513   :  { %v1309_v58 = vadd.f32 %v1308_v54, %v1304_v51  ;;  %v1321_v59 = vadd.f32 %v1320_v53, %v1318_v55 }
 0x515   :  { %v1310_v61 = vrot.slane %v1309_v58, 4  ;;  %v1322_v63 = vadd.f32 %v1321_v59, %v1319_v56 }
 0x517   :  { %v1311_v0 = vadd.f32 %v1310_v61, %v1309_v58  ;;  %v1323_v2 = vrot.slane %v1322_v63, 4 }
 0x519   :  { %v1312_v3 = vrot.slane %v1311_v0, 2  ;;  %v1324_v10 = vadd.f32 %v1323_v2, %v1322_v63 }
 0x51b   :  { %v1313_v11 = vadd.f32 %v1312_v3, %v1311_v0  ;;  %v1325_v28 = vrot.slane %v1324_v10, 2 }
 0x51d   :  { %v1314_v29 = vrot.slane %v1313_v11, 1  ;;  %v1326_v30 = vadd.f32 %v1325_v28, %v1324_v10 }
 0x51f   :  { %v1327_v32 = vrot.slane %v1326_v30, 1  ;;  %v1315_v33 = vadd.f32 %v1314_v29, %v1313_v11 }
 0x521   :  { %v1328_v5 = vadd.f32 %v1327_v32, %v1326_v30 }
 0x523   :  { %v1329_v35 = vsel %vm624_vm2, %v1315_v33, %v1328_v5 }
 0x524   :  { %2119 = vmatmul.mubr.f32.vlgmr.msra.gmra.mxu1 %v1329_v35 }
 0x5e4   :  { %v1396_v40 = vpop.f32.mrf.mxu1 }
 0x5e5   :  { %v1400_v34 = vmul.f32 0.001953125, %v1396_v40 }
 0x5e6   :  { %v2120_v41 = vpop.f32.mrf.mxu1 }
 0x5e7   :  { %v1401_v49 = vmul.f32 %v1400_v34, %v1400_v34 }
 0x5e9   :  { %v1403_v50 = vrot.slane %v1401_v49, 7 }
 0x5eb   :  { %v1405_v36 = vsub.f32 %v1400_v34, %v1403_v50 }
 0x5ed   :  { %v1406_v37 = vadd.f32 1e-05, %v1405_v36 }
 0x5ef   :  { %2136 = vrsqrt.f32 %v1406_v37 }
 0x5fc   :  { %v2137_v6 = vpop.eup %2136 }
 0x5fd   :  { %v1415_v7 = vrot.slane %v2137_v6, %v2516_v46 }
 0x5ff   :  { %v1416_v8 = vcombine.high %v1415_v7, %v1415_v7 }
 0x601   :  { %v1423_v9 = vrot.slane %v1416_v8, %v2516_v46 }
 0x603   :  { %v1425_v39 = vmul.f32 %v1423_v9, %v1305_v38 }
 0x605   :  { %v1426_v12 = vmul.f32 %v1425_v39, %v1400_v34 }
 0x607   :  { %v1427_v42 = vsub.f32 %v1306_v13, %v1426_v12 }
 0x609   :  { %v1432_v43 = vrot.slane %v1427_v42, %v2527_v57 }
 0x60b   :  { %v1434_v1 = vsel %vm624_vm2, %v1425_v39, %v1432_v43 }
 0x60c   :  { %2124 = vmatmul.mubr.msk.f32.vlgmr.msra.gmra.mxu0 %vm732_vm3, %v1434_v1 }
 0x6cc   :  { %v1504_v14 = vpop.f32.mrf.mxu0 }
 0x6cd   :  { %v1511_v15 = vrot.slane %v1504_v14, %v2527_v57  ;;  %v1519_v4 = vrot.slane %v1504_v14, %v816_v62  ;;  %v2140_v62 = vld [vmem:[%s2644_s0 + $0x10] sm:$0xff] }
 0x6ce   :  { %v2125_v46 = vpop.f32.mrf.mxu0 }
 0x6cf   :  { %v1512_v16 = vmul.f32 %v1511_v15, %v1301_v22  ;;  %v1513_v17 = vmul.f32 %v1511_v15, %v1302_v25  ;;  %v1514_v18 = vmul.f32 %v1511_v15, %v1303_v52  ;;  %v1515_v19 = vmul.f32 %v1511_v15, %v1304_v51  ;;  %v2141_v25 = vld [vmem:[%s2644_s0 + $0x18] sm:$0xff] }
 0x6d1   :  { %v1520_v20 = vadd.f32 %v1519_v4, %v1512_v16  ;;  %v1521_v21 = vadd.f32 %v1519_v4, %v1513_v17  ;;  %v1522_v23 = vadd.f32 %v1519_v4, %v1514_v18  ;;  %v1523_v24 = vadd.f32 %v1519_v4, %v1515_v19 }
 0x6d3   :  { %v1524_v26 = vadd.f32 %v2138_v31, %v1520_v20  ;;  %v1525_v57 = vadd.f32 %v2139_v45, %v1521_v21  ;;  %v1526_v22 = vadd.f32 %v2140_v62, %v1522_v23  ;;  %v1527_v44 = vadd.f32 %v2141_v25, %v1523_v24 }
 0x6d5   :  { %v1528_v60 = vmax.f32 %v1524_v26, 0.0  ;;  %v1529_v47 = vmax.f32 %v1525_v57, 0.0  ;;  %v1530_v27 = vmax.f32 %v1526_v22, 0.0  ;;  %v1531_v48 = vmax.f32 %v1527_v44, 0.0 }
 0x6d7   :  { %1532 = vst [vmem:[#allocation7] sm:$0xff] %v1528_v60  ;;  %1533 = vst [vmem:[#allocation7 + $0x8] sm:$0xff] %v1529_v47 }
 0x6d8   :  { %1534 = vst [vmem:[#allocation7 + $0x10] sm:$0xff] %v1530_v27  ;;  %1535 = vst [vmem:[#allocation7 + $0x18] sm:$0xff] %v1531_v48 }
 0x6d9   :  { %2193 = shalt.err (!%p2190_p0)
}
 0x6da   :  { %1547 = dma.vmem_to_hbm [thread:$0]  %s1542_s6, 512, %s2655_s11, [#allocation4], %s2209_s20, %s2209_s20, %s2210_s21  }
 0x6db   :  { %2206 = dma.done.wait [#allocation4], 512  }
 0x6dc   :  { %2207 = vsyncadd [#allocation4], 4294966784 }
 0x6dd   :  { %1551 = vsyncpa [#allocation3], 1 }
 0x6de   :  { %1552 = vsyncpa [#allocation6], 1 }
 0x6df   :  { %1553 = vsyncpa [#allocation4], 1 }

</bundles_post_ra>
